<compile_context>
chip_gen: v7x
topology: tpu7x:2x2x1
jax: 0.10.0
libtpu: 0.0.40
codegen_flags: <defaults>
</compile_context>

<pallas_src>
import functools

import jax
import jax.numpy as jnp
from jax import lax
from jax.experimental import pallas as pl
from jax.experimental.pallas import tpu as pltpu


def _round_up(x, m):
    return ((x + m - 1) // m) * m


def _patch_embed_kernel(x_ref, w_ref, p_ref, o_ref, *, eps, e_true):
    # x_ref: (tm, C)       token tile
    # w_ref: (C, E_pad)    projection weight (resident; padded cols are zero)
    # p_ref: (8, E_pad)    packed params: row0=bias, row1=gamma, row2=beta (rest 0)
    # o_ref: (tm, E_pad)   output tile (lane-dense last dim)
    x = x_ref[...].astype(jnp.float32)
    w = w_ref[...].astype(jnp.float32)

    # Projection on the MXU even for tiny C: the MXU sits in the vector-extended
    # slot and is otherwise idle; keeps the VALU slot free for the LayerNorm.
    y = jnp.dot(x, w, preferred_element_type=jnp.float32)
    y = y + p_ref[0:1, :]

    e_pad = o_ref.shape[1]
    inv_e = jnp.float32(1.0 / e_true)
    # Padded y columns are exactly zero (zero weight cols + zero bias), so the
    # plain row-sum already equals the sum over the true embed_dim.
    mean = jnp.sum(y, axis=-1, keepdims=True) * inv_e
    centered = y - mean
    sumsq = jnp.sum(centered * centered, axis=-1, keepdims=True)
    if e_pad != e_true:
        # Maskless correction: each zero-padded column contributes mean^2 to
        # sumsq; subtract it instead of a full-width mask multiply pass.
        sumsq = sumsq - jnp.float32(e_pad - e_true) * (mean * mean)
    var = sumsq * inv_e

    y_norm = centered * lax.rsqrt(var + eps)
    # Padded gamma/beta columns are zero -> padded output columns are zero
    # (sliced off in the wrapper anyway).
    o_ref[...] = (y_norm * p_ref[1:2, :] + p_ref[2:3, :]).astype(o_ref.dtype)


def overlap_patch_embed(x, proj_w, proj_b, ln_w, ln_b, *, stride=4, eps=1e-5,
                        tm=1024, out_dtype=None):
    """Forward of OverlapPatchEmbed.

    Args:
      x:        (B, C, H, W) float32, NCHW like PyTorch.
      proj_w:   (E, C) conv weight with the trailing 1x1 kernel dims squeezed
                (PyTorch weight shape is (E, C, 1, 1)).
      proj_b:   (E,) conv bias.
      ln_w:     (E,) LayerNorm weight.
      ln_b:     (E,) LayerNorm bias.
      out_dtype: output dtype (default x.dtype); pass jnp.bfloat16 to halve the
                 dominant HBM write if downstream accepts it.
    Returns:
      (out, Ho, Wo) with out of shape (B, Ho*Wo, E).
    """
    B, C, H, W = x.shape
    E = proj_w.shape[0]
    out_dtype = x.dtype if out_dtype is None else out_dtype

    # kernel_size=1, stride=s conv == strided spatial sampling + pointwise projection.
    # TODO(synk): the strided gather / NCHW->(N,C) relayout stays in plain JAX
    # (one extra HBM round-trip of N*C*4 bytes, ~1% of total traffic at C=3/4).
    x_s = x[:, :, ::stride, ::stride]                               # (B, C, Ho, Wo)
    Ho, Wo = x_s.shape[2], x_s.shape[3]
    N = B * Ho * Wo
    tokens = jnp.transpose(x_s, (0, 2, 3, 1)).reshape(N, C)         # (N, C)

    # Token tile: large tiles amortize the ~0.35us/step overhead and deepen the
    # DMA; never larger than the (8-rounded) problem itself.
    tm_eff = min(tm, _round_up(N, 8))
    tm_eff = max(8, _round_up(tm_eff, 8))
    # If the whole problem would be a single grid step but is large enough,
    # split it so the "parallel" axis can shard across v7x's two TensorCores.
    if _round_up(N, tm_eff) // tm_eff == 1 and N >= 256:
        tm_eff = _round_up((N + 1) // 2, 8)
    N_pad = _round_up(N, tm_eff)
    if N_pad != N:
        tokens = jnp.pad(tokens, ((0, N_pad - N), (0, 0)))

    # Lane-dense output: pad embed_dim up to a multiple of 128 (no-op for the
    # module's realistic embed_dim=768) so stores are unmasked vst.
    E_pad = _round_up(max(E, 128), 128)
    pad_e = E_pad - E

    w_ce = jnp.transpose(proj_w, (1, 0)).astype(jnp.float32)        # (C, E)
    if pad_e:
        w_ce = jnp.pad(w_ce, ((0, 0), (0, pad_e)))
    # Pack bias / gamma / beta into one sublane-padded (8, E_pad) resident operand.
    params = jnp.zeros((8, E_pad), jnp.float32)
    params = params.at[0, :E].set(proj_b.astype(jnp.float32))
    params = params.at[1, :E].set(ln_w.astype(jnp.float32))
    params = params.at[2, :E].set(ln_b.astype(jnp.float32))

    kernel = functools.partial(_patch_embed_kernel, eps=eps, e_true=E)

    grid = (N_pad // tm_eff,)
    out_bytes = N_pad * E_pad * jnp.dtype(out_dtype).itemsize
    cost = pl.CostEstimate(
        flops=2 * N_pad * C * E_pad,
        transcendentals=N_pad,                                      # one rsqrt per row
        bytes_accessed=4 * (N_pad * C + C * E_pad + 8 * E_pad) + out_bytes,
    )

    out_flat = pl.pallas_call(
        kernel,
        out_shape=jax.ShapeDtypeStruct((N_pad, E_pad), out_dtype),
        grid_spec=pltpu.PrefetchScalarGridSpec(
            num_scalar_prefetch=0,
            grid=grid,
            in_specs=[
                pl.BlockSpec((tm_eff, C), lambda i: (i, 0)),        # token tile
                pl.BlockSpec((C, E_pad), lambda i: (0, 0)),         # weight (resident)
                pl.BlockSpec((8, E_pad), lambda i: (0, 0)),         # packed bias/gamma/beta
            ],
            out_specs=pl.BlockSpec((tm_eff, E_pad), lambda i: (i, 0)),
        ),
        compiler_params=pltpu.CompilerParams(
            dimension_semantics=("parallel",),       # v7x: shard grid over 2 TCs
            vmem_limit_bytes=32 * 1024 * 1024,       # safe on v5e/v6e/v7x; usage ~7 MiB
        ),
        cost_estimate=cost,
    )(tokens, w_ce, params)

    out = out_flat[:N, :E].reshape(B, Ho * Wo, E)
    return out, Ho, Wo


def _reference(x, proj_w, proj_b, ln_w, ln_b, *, stride=4, eps=1e-5):
    B, C, H, W = x.shape
    x_s = x[:, :, ::stride, ::stride]
    Ho, Wo = x_s.shape[2], x_s.shape[3]
    tok = jnp.transpose(x_s, (0, 2, 3, 1)).reshape(B, Ho * Wo, C)
    y = jnp.einsum("bnc,ec->bne", tok, proj_w) + proj_b
    mu = jnp.mean(y, axis=-1, keepdims=True)
    var = jnp.mean((y - mu) ** 2, axis=-1, keepdims=True)
    return ((y - mu) / jnp.sqrt(var + eps)) * ln_w + ln_b, Ho, Wo


if __name__ == "__main__":
    # Small shapes consistent with the module's forward:
    # batch=2, in_chans=4, spatial=16x16, stride=4, embed_dim=32.
    B, C, H, W = 2, 4, 16, 16
    E, stride = 32, 4

    key = jax.random.PRNGKey(0)
    k_x, k_w, k_b, _ = jax.random.split(key, 4)

    x = jax.random.normal(k_x, (B, C, H, W), dtype=jnp.float32)
    # Conv2d(in_chans, embed_dim, kernel_size=1): weight (E, C, 1, 1) -> (E, C).
    fan_out = 1 * 1 * E
    proj_w = jax.random.normal(k_w, (E, C), dtype=jnp.float32) * (2.0 / fan_out) ** 0.5
    proj_b = 0.01 * jax.random.normal(k_b, (E,), dtype=jnp.float32)
    # LayerNorm(embed_dim): weight=1, bias=0 per _init_weights.
    ln_w = jnp.ones((E,), dtype=jnp.float32)
    ln_b = jnp.zeros((E,), dtype=jnp.float32)

    out, Ho, Wo = overlap_patch_embed(x, proj_w, proj_b, ln_w, ln_b, stride=stride)
    out = jax.block_until_ready(out)

    ref, Ho_r, Wo_r = _reference(x, proj_w, proj_b, ln_w, ln_b, stride=stride)
    assert (Ho, Wo) == (Ho_r, Wo_r)
    assert out.shape == (B, Ho * Wo, E)
    assert jnp.allclose(out, ref, atol=1e-4, rtol=1e-4)

    print("KERNEL_OK")
</pallas_src>

<mosaic_0001>
module attributes {stable_mosaic.version = 11 : i64} {
  func.func @_patch_embed_kernel(%arg0: i32, %arg1: memref<32x4xf32, #tpu.memory_space<vmem>>, %arg2: memref<4x128xf32, #tpu.memory_space<vmem>>, %arg3: memref<8x128xf32, #tpu.memory_space<vmem>>, %arg4: memref<32x128xf32, #tpu.memory_space<vmem>>) attributes {dimension_semantics = [#tpu.dimension_semantics<parallel>], iteration_bounds = array<i64: 1>, scalar_prefetch = 0 : i64, scratch_operands = 0 : i64, tpu.core_type = #tpu.core_type<tc>, window_params = [{transform_indices = @transform_0, window_bounds = array<i64: 32, 4>}, {pipeline_mode = #tpu.pipeline_mode<synchronous>, transform_indices = @transform_1, window_bounds = array<i64: 4, 128>}, {pipeline_mode = #tpu.pipeline_mode<synchronous>, transform_indices = @transform_2, window_bounds = array<i64: 8, 128>}, {transform_indices = @transform_3, window_bounds = array<i64: 32, 128>}]} {
    %c0 = arith.constant 0 : index
    %c0_0 = arith.constant 0 : index
    %0 = vector.load %arg1[%c0, %c0_0] : memref<32x4xf32, #tpu.memory_space<vmem>>, vector<32x4xf32>
    %c0_1 = arith.constant 0 : index
    %c0_2 = arith.constant 0 : index
    %1 = vector.load %arg2[%c0_1, %c0_2] : memref<4x128xf32, #tpu.memory_space<vmem>>, vector<4x128xf32>
    %cst = arith.constant dense<0.000000e+00> : vector<32x128xf32>
    %2 = tpu.matmul %0, %1, %cst {dimension_numbers = #tpu.dot_dimension_numbers<[1], [0], [0], [1], [0, 0, 1, 1], [], []>} : vector<32x4xf32>, vector<4x128xf32>, vector<32x128xf32> -> vector<32x128xf32>
    %c0_3 = arith.constant 0 : index
    %c0_4 = arith.constant 0 : index
    %3 = vector.load %arg3[%c0_3, %c0_4] : memref<8x128xf32, #tpu.memory_space<vmem>>, vector<1x128xf32>
    %4 = vector.broadcast %3 : vector<1x128xf32> to vector<32x128xf32>
    %5 = arith.addf %2, %4 : vector<32x128xf32>
    %cst_5 = arith.constant dense<0.000000e+00> : vector<32xf32>
    %6 = vector.multi_reduction <add>, %5, %cst_5 [1] : vector<32x128xf32> to vector<32xf32>
    %7 = vector.shape_cast %6 : vector<32xf32> to vector<32x1xf32>
    %cst_6 = arith.constant 3.125000e-02 : f32
    %8 = vector.broadcast %cst_6 : f32 to vector<32x1xf32>
    %9 = arith.mulf %7, %8 : vector<32x1xf32>
    %10 = vector.broadcast %9 : vector<32x1xf32> to vector<32x128xf32>
    %11 = arith.subf %5, %10 : vector<32x128xf32>
    %12 = arith.mulf %11, %11 : vector<32x128xf32>
    %cst_7 = arith.constant dense<0.000000e+00> : vector<32xf32>
    %13 = vector.multi_reduction <add>, %12, %cst_7 [1] : vector<32x128xf32> to vector<32xf32>
    %14 = vector.shape_cast %13 : vector<32xf32> to vector<32x1xf32>
    %15 = arith.mulf %9, %9 : vector<32x1xf32>
    %cst_8 = arith.constant 9.600000e+01 : f32
    %16 = vector.broadcast %cst_8 : f32 to vector<32x1xf32>
    %17 = arith.mulf %16, %15 : vector<32x1xf32>
    %18 = arith.subf %14, %17 : vector<32x1xf32>
    %cst_9 = arith.constant 3.125000e-02 : f32
    %19 = vector.broadcast %cst_9 : f32 to vector<32x1xf32>
    %20 = arith.mulf %18, %19 : vector<32x1xf32>
    %cst_10 = arith.constant 9.99999974E-6 : f32
    %21 = vector.broadcast %cst_10 : f32 to vector<32x1xf32>
    %22 = arith.addf %20, %21 : vector<32x1xf32>
    %23 = math.rsqrt %22 : vector<32x1xf32>
    %24 = vector.broadcast %23 : vector<32x1xf32> to vector<32x128xf32>
    %25 = arith.mulf %11, %24 : vector<32x128xf32>
    %c1 = arith.constant 1 : index
    %c0_11 = arith.constant 0 : index
    %26 = vector.load %arg3[%c1, %c0_11] : memref<8x128xf32, #tpu.memory_space<vmem>>, vector<1x128xf32>
    %27 = vector.broadcast %26 : vector<1x128xf32> to vector<32x128xf32>
    %28 = arith.mulf %25, %27 : vector<32x128xf32>
    %c2 = arith.constant 2 : index
    %c0_12 = arith.constant 0 : index
    %29 = vector.load %arg3[%c2, %c0_12] : memref<8x128xf32, #tpu.memory_space<vmem>>, vector<1x128xf32>
    %30 = vector.broadcast %29 : vector<1x128xf32> to vector<32x128xf32>
    %31 = arith.addf %28, %30 : vector<32x128xf32>
    %c0_13 = arith.constant 0 : index
    %c0_14 = arith.constant 0 : index
    %32 = vector.load %arg4[%c0_13, %c0_14] : memref<32x128xf32, #tpu.memory_space<vmem>>, vector<32x128xf32>
    tpu.vector_store %arg4[%c0_13, %c0_14], %31 {strides = array<i32>} : memref<32x128xf32, #tpu.memory_space<vmem>>, vector<32x128xf32>,
    return
  }
  func.func @transform_0(%arg0: i32) -> (i32, i32) {
    %c0_i32 = arith.constant 0 : i32
    %c0_i32_0 = arith.constant 0 : i32
    return %arg0, %c0_i32 : i32, i32
  }
  func.func @transform_1(%arg0: i32) -> (i32, i32) {
    %c0_i32 = arith.constant 0 : i32
    %c0_i32_0 = arith.constant 0 : i32
    %c0_i32_1 = arith.constant 0 : i32
    return %c0_i32, %c0_i32_0 : i32, i32
  }
  func.func @transform_2(%arg0: i32) -> (i32, i32) {
    %c0_i32 = arith.constant 0 : i32
    %c0_i32_0 = arith.constant 0 : i32
    %c0_i32_1 = arith.constant 0 : i32
    return %c0_i32, %c0_i32_0 : i32, i32
  }
  func.func @transform_3(%arg0: i32) -> (i32, i32) {
    %c0_i32 = arith.constant 0 : i32
    %c0_i32_0 = arith.constant 0 : i32
    return %arg0, %c0_i32 : i32, i32
  }
}

</mosaic_0001>

<bundles_post_ra>
// kernel: tpu_custom_call.1
= control target key start
LH: loop header
LB: loop body
LE: loop exit
PB: predicated region body
PF: predicated region fallthrough
CT: control target
= control target key end

     0   :  { %vm38_vm0 = vcmask 1043456   ;;  %vm25_vm1 = vcmask 31744   ;;  %s338_s0 = inlined_call_operand.vmem [shape: f32[32,4], index: 0, kind: input, shape index: {}]   ;;  %s339_s1 = inlined_call_operand.vmem [shape: f32[4,128], index: 1, kind: input, shape index: {}]   ;;  %s340_s2 = inlined_call_operand.vmem [shape: f32[8,128], index: 2, kind: input, shape index: {}]   ;;  %s341_s3 = inlined_call_operand.hbm [shape: f32[32,128], index: 3, kind: output, shape index: {}]  }
   0x1   :  { %v19_v0 = vld [vmem:[%s339_s1] sm:$0xf]  ;;  %v17_v2 = vld [vmem:[%s338_s0 + $0x10] sm:$0xff]  ;;  %v16_v3 = vld [vmem:[%s338_s0 + $0x8] sm:$0xff] }
   0x2   :  { %v15_v1 = vld [vmem:[%s338_s0] sm:$0xff]  ;;  %234 = vmatprep.subr.msk.mxu0 %vm38_vm0, %v19_v0  ;;  %242 = vmatprep.subr.msk.mxu1 %vm38_vm0, %v19_v0  ;;  %v18_v4 = vld [vmem:[%s338_s0 + $0x18] sm:$0xff] }
   0x3   :  { %8 = vsyncpa [#allocation3], 0  ;;  %235 = vmatpush3.msk.msra.mxu0 %vm38_vm0, %v19_v0  ;;  %243 = vmatpush3.msk.msra.mxu1 %vm38_vm0, %v19_v0  ;;  %v221_v5 = vld [vmem:[%s340_s2] ss:$0 sm:$0xff]  ;;  %v227_v55 = vld [vmem:[%s340_s2 + $0x1] ss:$0 sm:$0xff] }
   0x4   :  { %236 = vmatprep.mubr.msk.f32.mxu0 %vm25_vm1, %v15_v1  ;;  %239 = vmatprep.mubr.msk.f32.mxu1 %vm25_vm1, %v17_v2  ;;  %v228_v57 = vld [vmem:[%s340_s2 + $0x2] ss:$0 sm:$0xff]  ;;  %s279_s26 = smov [#allocation2]  }
   0x5   :  { %237 = vmatmul.mubr.msk.f32.vlgmr.msra.gmra.mrb[0].mxu0 %vm25_vm1, %v16_v3  ;;  %240 = vmatmul.mubr.msk.f32.vlgmr.msra.gmra.mrb[0].mxu1 %vm25_vm1, %v18_v4  ;;  %s210_s27 = sshll.u32 %s279_s26, 4  ;;  %s211_s27 = int_to_ptr.vmem [resolvable:$true] %s210_s27 }
   0x6   :  { %s255_s2 = scalar_lea.vmem %s211_s27, 512  ;;  %p260_p1 = scmp.lt.s32.totalorder %s211_s27, %s211_s27 }
   0x7   :  { %p256_p0 = scmp.ne.s32.totalorder %s211_s27, %s255_s2  ;;  %p261_p2 = scmp.lt.s32.totalorder %s255_s2, %s255_s2 }
   0x9   :  { %p262_p3 = por %p261_p2, %p260_p1 }
   0xb   :  { %p263_p4 = pnand %p262_p3, %p256_p0 }
  0xd8   :  { %v238_v6 = vpop.f32.mrb[0].mxu0  ;;  %v241_v7 = vpop.f32.mrb[0].mxu1 }
  0xd9   :  { %v108_v8 = vpop.f32.mrb[1].mxu0  ;;  %v118_v9 = vpop.f32.mrb[1].mxu1  ;;  %v124_v12 = vadd.f32 %v241_v7, %v221_v5  ;;  %v114_v13 = vadd.f32 %v238_v6, %v221_v5 }
  0xda   :  { %v109_v10 = vadd.f32 %v221_v5, %v108_v8  ;;  %v119_v11 = vadd.f32 %v221_v5, %v118_v9 }
  0xdc   :  { %131 = vadd.xlane.f32.xlu1 %v119_v11  ;;  %127 = vadd.xlane.f32.xlu0 %v109_v10 }
  0xe0   :  { %133 = vadd.xlane.f32.xlu1 %v124_v12  ;;  %129 = vadd.xlane.f32.xlu0 %v114_v13 }
 0x169   :  { %v132_v14 = vpop.xlane.xlu1 %131  ;;  %v128_v15 = vpop.xlane.xlu0 %127 }
 0x16a   :  { %v137_v16 = vmul.f32 0.03125, %v132_v14  ;;  %v135_v17 = vmul.f32 0.03125, %v128_v15 }
 0x16c   :  { %v139_v18 = vsub.f32 %v109_v10, %v135_v17  ;;  %v141_v21 = vsub.f32 %v119_v11, %v137_v16  ;;  %v155_v30 = vmul.f32 %v135_v17, %v135_v17  ;;  %v157_v31 = vmul.f32 %v137_v16, %v137_v16 }
 0x16d   :  { %v134_v19 = vpop.xlane.xlu1 %133  ;;  %v130_v20 = vpop.xlane.xlu0 %129 }
 0x16e   :  { %v138_v22 = vmul.f32 0.03125, %v134_v19  ;;  %v136_v23 = vmul.f32 0.03125, %v130_v20  ;;  %v143_v24 = vmul.f32 %v139_v18, %v139_v18  ;;  %v145_v27 = vmul.f32 %v141_v21, %v141_v21 }
 0x16f   :  { %v159_v33 = vmul.f32 96.0, %v155_v30  ;;  %v161_v39 = vmul.f32 96.0, %v157_v31 }
 0x170   :  { %v140_v25 = vsub.f32 %v114_v13, %v136_v23  ;;  %147 = vadd.xlane.f32.xlu0 %v143_v24  ;;  %v142_v26 = vsub.f32 %v124_v12, %v138_v22  ;;  %v156_v32 = vmul.f32 %v136_v23, %v136_v23  ;;  %v158_v36 = vmul.f32 %v138_v22, %v138_v22 }
 0x172   :  { %v144_v28 = vmul.f32 %v140_v25, %v140_v25  ;;  %v146_v29 = vmul.f32 %v142_v26, %v142_v26  ;;  %v160_v38 = vmul.f32 96.0, %v156_v32  ;;  %v162_v47 = vmul.f32 96.0, %v158_v36 }
 0x174   :  { %151 = vadd.xlane.f32.xlu0 %v145_v27  ;;  %149 = vadd.xlane.f32.xlu1 %v144_v28 }
 0x178   :  { %153 = vadd.xlane.f32.xlu1 %v146_v29 }
 0x1fd   :  { %v148_v34 = vpop.xlane.xlu0 %147 }
 0x1fe   :  { %v163_v35 = vsub.f32 %v148_v34, %v159_v33 }
 0x200   :  { %v167_v37 = vmul.f32 0.03125, %v163_v35 }
 0x201   :  { %v150_v40 = vpop.xlane.xlu1 %149  ;;  %v152_v41 = vpop.xlane.xlu0 %151 }
 0x202   :  { %v171_v42 = vadd.f32 1e-05, %v167_v37  ;;  %v164_v43 = vsub.f32 %v150_v40, %v160_v38  ;;  %v165_v44 = vsub.f32 %v152_v41, %v161_v39 }
 0x204   :  { %247 = vrsqrt.f32 %v171_v42  ;;  %v168_v45 = vmul.f32 0.03125, %v164_v43  ;;  %v169_v46 = vmul.f32 0.03125, %v165_v44 }
 0x205   :  { %v154_v48 = vpop.xlane.xlu1 %153 }
 0x206   :  { %v172_v49 = vadd.f32 1e-05, %v168_v45  ;;  %v173_v50 = vadd.f32 1e-05, %v169_v46  ;;  %v166_v51 = vsub.f32 %v154_v48, %v162_v47 }
 0x208   :  { %249 = vrsqrt.f32 %v172_v49  ;;  %v170_v52 = vmul.f32 0.03125, %v166_v51 }
 0x209   :  { %251 = vrsqrt.f32 %v173_v50 }
 0x20a   :  { %v174_v53 = vadd.f32 1e-05, %v170_v52 }
 0x20c   :  { %253 = vrsqrt.f32 %v174_v53 }
 0x20e   :  { %v248_v54 = vpop.eup %247 }
 0x20f   :  { %v179_v56 = vmul.f32 %v248_v54, %v139_v18 }
 0x211   :  { %v188_v58 = vmul.f32 %v227_v55, %v179_v56 }
 0x212   :  { %v250_v59 = vpop.eup %249 }
 0x213   :  { %v252_v60 = vpop.eup %251  ;;  %v180_v61 = vmul.f32 %v250_v59, %v140_v25  ;;  %v197_v62 = vadd.f32 %v228_v57, %v188_v58 }
 0x214   :  { %v181_v63 = vmul.f32 %v252_v60, %v141_v21 }
 0x215   :  { %v189_v0 = vmul.f32 %v227_v55, %v180_v61  ;;  %201 = vst [vmem:[#allocation2] sm:$0xff] %v197_v62 }
 0x216   :  { %v254_v1 = vpop.eup %253  ;;  %v190_v2 = vmul.f32 %v227_v55, %v181_v63 }
 0x217   :  { %v182_v3 = vmul.f32 %v254_v1, %v142_v26  ;;  %v198_v4 = vadd.f32 %v228_v57, %v189_v0 }
 0x218   :  { %v199_v5 = vadd.f32 %v228_v57, %v190_v2 }
 0x219   :  { %v191_v6 = vmul.f32 %v227_v55, %v182_v3  ;;  %202 = vst [vmem:[#allocation2 + $0x8] sm:$0xff] %v198_v4 }
 0x21a   :  { %203 = vst [vmem:[#allocation2 + $0x10] sm:$0xff] %v199_v5 }
 0x21b   :  { %v200_v7 = vadd.f32 %v228_v57, %v191_v6 }
 0x21d   :  { %204 = vst [vmem:[#allocation2 + $0x18] sm:$0xff] %v200_v7 }
 0x21e   :  { %266 = shalt.err (!%p263_p4)
}
 0x21f   :  { %s267_s30 = scalar_lea.hbm %s341_s3, 512 }
 0x220   :  { %p268_p5 = scmp.ne.s32.totalorder %s341_s3, %s267_s30  ;;  %p271_p6 = scmp.lt.u32.totalorder %s267_s30, %s341_s3 }
 0x222   :  { %p273_p7 = pnand %p271_p6, %p268_p5 }
 0x224   :  { %276 = shalt.err (!%p273_p7)
}
 0x225   :  { %s280_s8 = smov 128   ;;  %s281_s9 = smov 8  }
 0x226   :  { %216 = dma.vmem_to_hbm [thread:$0]  %s211_s27, 512, %s341_s3, [#allocation3], %s280_s8, %s280_s8, %s281_s9  }
 0x227   :  { %277 = dma.done.wait [#allocation3], 512  }
 0x228   :  { %278 = vsyncadd [#allocation3], 4294966784 }
 0x229   :  { %220 = vsyncpa [#allocation3], 1 }

</bundles_post_ra>
